<compile_context>
chip_gen: v6e
topology: v6e:2x2x1
jax: 0.10.0
libtpu: 0.0.40
codegen_flags: <defaults>
</compile_context>

<pallas_src>
import math

import jax
import jax.numpy as jnp
from jax.experimental import pallas as pl
from jax.experimental.pallas import tpu as pltpu

# ---------------- model dims (small, consistent with the module) -------------
B = 2          # batch
S = 8          # sequence length
H = 32         # roberta_config.hidden_size
DN = 16        # neuron_config neuron (head) dim
N = 4          # number of neurons in the bank
EPS = 1e-12    # roberta layer_norm_eps


def _dot(a, b):
    # contract last dim of a with first dim of b, f32 accumulation on MXU
    return jax.lax.dot_general(
        a, b, (((a.ndim - 1,), (0,)), ((), ())),
        preferred_element_type=jnp.float32)


def _dot_t(a, b):
    # contract last dim of a with last dim of b (i.e. a @ b.T), no transpose op
    return jax.lax.dot_general(
        a, b, (((a.ndim - 1,), (b.ndim - 1,)), ((), ())),
        preferred_element_type=jnp.float32)


def _softmax_last(x):
    m = jnp.max(x, axis=-1, keepdims=True)
    e = jnp.exp(x - m)
    denom = jnp.sum(e, axis=-1, keepdims=True)
    return e * pl.reciprocal(denom, approx=True)


def neuronal_layer_kernel(x_ref, gamma_ref, beta_ref,
                          wkvq_ref, qn_ref, wnkv_ref, wo_ref,
                          out_ref, nkv_ref):
    x = x_ref[...]                                   # (B*S, H)

    # ---- LayerNorm over hidden dim -----------------------------------------
    mean = jnp.mean(x, axis=-1, keepdims=True)
    var = jnp.mean(jnp.square(x - mean), axis=-1, keepdims=True)
    xn = (x - mean) * jax.lax.rsqrt(var + EPS)
    xn = xn * gamma_ref[...] + beta_ref[...]         # (B*S, H)

    # ---- fused token projections: [K | V | Q(pre-scaled)] -------------------
    kvq = _dot(xn, wkvq_ref[...])                    # (B*S, 3*DN)

    qn = qn_ref[...]                                 # (N, DN), pre-scaled
    wnkv = wnkv_ref[...]                             # (DN, 2*DN)

    ctx_rows = []
    for b in range(B):                               # static loop, B=2
        kvq_b = jax.lax.slice(kvq, (b * S, 0), ((b + 1) * S, 3 * DN))
        k_b = kvq_b[:, 0:DN]                         # (S, DN)
        v_b = kvq_b[:, DN:2 * DN]                    # (S, DN)
        q_b = kvq_b[:, 2 * DN:3 * DN]                # (S, DN), scale folded in

        # ---- NeuronBank: learned neuron queries attend over encoded inputs -
        bank_scores = _dot_t(qn, k_b)                # (N, S)
        bank_probs = _softmax_last(bank_scores)      # (N, S)
        bank_out = _dot(bank_probs, v_b)             # (N, DN)
        nkv_b = _dot(bank_out, wnkv)                 # (N, 2*DN) = [nK | nV]
        n_k = nkv_b[:, 0:DN]
        n_v = nkv_b[:, DN:2 * DN]

        # ---- NeuronDecoder: tokens cross-attend to the new neuron states ---
        dec_scores = _dot_t(q_b, n_k)                # (S, N)
        dec_probs = _softmax_last(dec_scores)        # (S, N)
        ctx_rows.append(_dot(dec_probs, n_v))        # (S, DN)

        nkv_ref[b] = nkv_b                           # packed neuron states

    ctx = jnp.concatenate(ctx_rows, axis=0)          # (B*S, DN)
    addition = _dot(ctx, wo_ref[...])                # (B*S, H)

    # ---- residual ------------------------------------------------------------
    out_ref[...] = x + addition


def neuronal_layer(hidden_states, params):
    (gamma, beta, wk, wv, wq, qn, wnk, wnv, wo) = params
    scale = 1.0 / math.sqrt(DN)

    # Parameter packing (layout plumbing outside the kernel):
    #   fold 1/sqrt(DN) into the query paths, fuse projections.
    w_kvq = jnp.concatenate([wk, wv, wq * scale], axis=-1)   # (H, 3*DN)
    w_nkv = jnp.concatenate([wnk, wnv], axis=-1)             # (DN, 2*DN)
    qn_scaled = qn * scale                                   # (N, DN)

    x_flat = hidden_states.reshape(B * S, H)

    vmem = pl.BlockSpec(memory_space=pltpu.MemorySpace.VMEM)

    out_flat, nkv = pl.pallas_call(
        neuronal_layer_kernel,
        out_shape=(
            jax.ShapeDtypeStruct((B * S, H), jnp.float32),    # out_states
            jax.ShapeDtypeStruct((B, N, 2 * DN), jnp.float32),  # [nK | nV]
        ),
        in_specs=[vmem] * 7,
        out_specs=(vmem, vmem),
        cost_estimate=pl.CostEstimate(
            flops=90_000, transcendentals=200, bytes_accessed=16_000),
    )(x_flat, gamma, beta, w_kvq, qn_scaled, w_nkv, wo)

    out_states = out_flat.reshape(B, S, H)
    n_k = nkv[:, :, :DN]
    n_v = nkv[:, :, DN:]
    return out_states, n_k, n_v


# ---------------- pure-JAX reference (same math) ------------------------------
def reference(hidden_states, params):
    (gamma, beta, wk, wv, wq, qn, wnk, wnv, wo) = params
    x = hidden_states
    mean = jnp.mean(x, axis=-1, keepdims=True)
    var = jnp.mean(jnp.square(x - mean), axis=-1, keepdims=True)
    xn = (x - mean) * jax.lax.rsqrt(var + EPS) * gamma[0] + beta[0]
    k_in = jnp.einsum("bsh,hd->bsd", xn, wk)
    v_in = jnp.einsum("bsh,hd->bsd", xn, wv)
    scale = 1.0 / math.sqrt(DN)
    bank = jax.nn.softmax(jnp.einsum("nd,bsd->bns", qn, k_in) * scale, axis=-1)
    bank_out = jnp.einsum("bns,bsd->bnd", bank, v_in)
    n_k = jnp.einsum("bnd,de->bne", bank_out, wnk)
    n_v = jnp.einsum("bnd,de->bne", bank_out, wnv)
    q_tok = jnp.einsum("bsh,hd->bsd", xn, wq)
    dec = jax.nn.softmax(jnp.einsum("bsd,bnd->bsn", q_tok, n_k) * scale, axis=-1)
    ctx = jnp.einsum("bsn,bnd->bsd", dec, n_v)
    out = x + jnp.einsum("bsd,dh->bsh", ctx, wo)
    return out, n_k, n_v


if __name__ == "__main__":
    key = jax.random.PRNGKey(0)
    ks = jax.random.split(key, 10)
    std = 0.02
    hidden_states = jax.random.normal(ks[0], (B, S, H), jnp.float32)
    params = (
        jnp.ones((1, H), jnp.float32),                           # gamma
        jnp.zeros((1, H), jnp.float32),                          # beta
        std * jax.random.normal(ks[1], (H, DN), jnp.float32),    # Wk
        std * jax.random.normal(ks[2], (H, DN), jnp.float32),    # Wv
        std * jax.random.normal(ks[3], (H, DN), jnp.float32),    # Wq
        std * jax.random.normal(ks[4], (N, DN), jnp.float32),    # neuron queries
        std * jax.random.normal(ks[5], (DN, DN), jnp.float32),   # Wnk
        std * jax.random.normal(ks[6], (DN, DN), jnp.float32),   # Wnv
        std * jax.random.normal(ks[7], (DN, H), jnp.float32),    # Wo
    )

    out_states, n_k, n_v = jax.block_until_ready(
        jax.jit(neuronal_layer)(hidden_states, params))

    ref_out, ref_nk, ref_nv = reference(hidden_states, params)
    assert jnp.allclose(out_states, ref_out, atol=1e-4, rtol=1e-4)
    assert jnp.allclose(n_k, ref_nk, atol=1e-4, rtol=1e-4)
    assert jnp.allclose(n_v, ref_nv, atol=1e-4, rtol=1e-4)

    print("KERNEL_OK")
</pallas_src>

<mosaic_0001>
module attributes {stable_mosaic.version = 11 : i64} {
  func.func @neuronal_layer_kernel(%arg0: memref<16x32xf32, #tpu.memory_space<vmem>>, %arg1: memref<1x32xf32, #tpu.memory_space<vmem>>, %arg2: memref<1x32xf32, #tpu.memory_space<vmem>>, %arg3: memref<32x48xf32, #tpu.memory_space<vmem>>, %arg4: memref<4x16xf32, #tpu.memory_space<vmem>>, %arg5: memref<16x32xf32, #tpu.memory_space<vmem>>, %arg6: memref<16x32xf32, #tpu.memory_space<vmem>>, %arg7: memref<16x32xf32, #tpu.memory_space<vmem>>, %arg8: memref<2x4x32xf32, #tpu.memory_space<vmem>>) attributes {dimension_semantics = [], scalar_prefetch = 0 : i64, scratch_operands = 0 : i64, tpu.core_type = #tpu.core_type<tc>} {
    %c0 = arith.constant 0 : index
    %c0_0 = arith.constant 0 : index
    %0 = vector.load %arg0[%c0, %c0_0] : memref<16x32xf32, #tpu.memory_space<vmem>>, vector<16x32xf32>
    %cst = arith.constant dense<0.000000e+00> : vector<16xf32>
    %1 = vector.multi_reduction <add>, %0, %cst [1] : vector<16x32xf32> to vector<16xf32>
    %2 = vector.shape_cast %1 : vector<16xf32> to vector<16x1xf32>
    %cst_1 = arith.constant 3.200000e+01 : f32
    %3 = vector.broadcast %cst_1 : f32 to vector<16x1xf32>
    %4 = arith.divf %2, %3 : vector<16x1xf32>
    %5 = vector.broadcast %4 : vector<16x1xf32> to vector<16x32xf32>
    %6 = arith.subf %0, %5 : vector<16x32xf32>
    %7 = arith.mulf %6, %6 : vector<16x32xf32>
    %cst_2 = arith.constant dense<0.000000e+00> : vector<16xf32>
    %8 = vector.multi_reduction <add>, %7, %cst_2 [1] : vector<16x32xf32> to vector<16xf32>
    %9 = vector.shape_cast %8 : vector<16xf32> to vector<16x1xf32>
    %cst_3 = arith.constant 3.200000e+01 : f32
    %10 = vector.broadcast %cst_3 : f32 to vector<16x1xf32>
    %11 = arith.divf %9, %10 : vector<16x1xf32>
    %12 = vector.broadcast %4 : vector<16x1xf32> to vector<16x32xf32>
    %13 = arith.subf %0, %12 : vector<16x32xf32>
    %cst_4 = arith.constant 9.99999996E-13 : f32
    %14 = vector.broadcast %cst_4 : f32 to vector<16x1xf32>
    %15 = arith.addf %11, %14 : vector<16x1xf32>
    %16 = math.rsqrt %15 : vector<16x1xf32>
    %17 = vector.broadcast %16 : vector<16x1xf32> to vector<16x32xf32>
    %18 = arith.mulf %13, %17 : vector<16x32xf32>
    %c0_5 = arith.constant 0 : index
    %c0_6 = arith.constant 0 : index
    %19 = vector.load %arg1[%c0_5, %c0_6] : memref<1x32xf32, #tpu.memory_space<vmem>>, vector<1x32xf32>
    %20 = vector.broadcast %19 : vector<1x32xf32> to vector<16x32xf32>
    %21 = arith.mulf %18, %20 : vector<16x32xf32>
    %c0_7 = arith.constant 0 : index
    %c0_8 = arith.constant 0 : index
    %22 = vector.load %arg2[%c0_7, %c0_8] : memref<1x32xf32, #tpu.memory_space<vmem>>, vector<1x32xf32>
    %23 = vector.broadcast %22 : vector<1x32xf32> to vector<16x32xf32>
    %24 = arith.addf %21, %23 : vector<16x32xf32>
    %c0_9 = arith.constant 0 : index
    %c0_10 = arith.constant 0 : index
    %25 = vector.load %arg3[%c0_9, %c0_10] : memref<32x48xf32, #tpu.memory_space<vmem>>, vector<32x48xf32>
    %cst_11 = arith.constant dense<0.000000e+00> : vector<16x48xf32>
    %26 = tpu.matmul %24, %25, %cst_11 {dimension_numbers = #tpu.dot_dimension_numbers<[1], [0], [0], [1], [0, 0, 1, 1], [], []>} : vector<16x32xf32>, vector<32x48xf32>, vector<16x48xf32> -> vector<16x48xf32>
    %c0_12 = arith.constant 0 : index
    %c0_13 = arith.constant 0 : index
    %27 = vector.load %arg4[%c0_12, %c0_13] : memref<4x16xf32, #tpu.memory_space<vmem>>, vector<4x16xf32>
    %c0_14 = arith.constant 0 : index
    %c0_15 = arith.constant 0 : index
    %28 = vector.load %arg5[%c0_14, %c0_15] : memref<16x32xf32, #tpu.memory_space<vmem>>, vector<16x32xf32>
    %29 = vector.extract_strided_slice %26 {offsets = [0, 0], sizes = [8, 48], strides = [1, 1]} : vector<16x48xf32> to vector<8x48xf32>
    %30 = vector.extract_strided_slice %29 {offsets = [0, 0], sizes = [8, 16], strides = [1, 1]} : vector<8x48xf32> to vector<8x16xf32>
    %31 = vector.extract_strided_slice %29 {offsets = [0, 16], sizes = [8, 16], strides = [1, 1]} : vector<8x48xf32> to vector<8x16xf32>
    %32 = vector.extract_strided_slice %29 {offsets = [0, 32], sizes = [8, 16], strides = [1, 1]} : vector<8x48xf32> to vector<8x16xf32>
    %cst_16 = arith.constant dense<0.000000e+00> : vector<4x8xf32>
    %33 = tpu.matmul %27, %30, %cst_16 {dimension_numbers = #tpu.dot_dimension_numbers<[1], [1], [0], [0], [0, 0, 1, 0], [], []>} : vector<4x16xf32>, vector<8x16xf32>, vector<4x8xf32> -> vector<4x8xf32>
    %cst_17 = arith.constant dense<0xFF800000> : vector<4xf32>
    %34 = vector.multi_reduction <maximumf>, %33, %cst_17 [1] : vector<4x8xf32> to vector<4xf32>
    %35 = vector.shape_cast %34 : vector<4xf32> to vector<4x1xf32>
    %36 = vector.broadcast %35 : vector<4x1xf32> to vector<4x8xf32>
    %37 = arith.subf %33, %36 : vector<4x8xf32>
    %38 = math.exp %37 : vector<4x8xf32>
    %cst_18 = arith.constant dense<0.000000e+00> : vector<4xf32>
    %39 = vector.multi_reduction <add>, %38, %cst_18 [1] : vector<4x8xf32> to vector<4xf32>
    %40 = vector.shape_cast %39 : vector<4xf32> to vector<4x1xf32>
    %41 = tpu.reciprocal %40 {approx = true} : vector<4x1xf32> -> vector<4x1xf32>
    %42 = vector.broadcast %41 : vector<4x1xf32> to vector<4x8xf32>
    %43 = arith.mulf %38, %42 : vector<4x8xf32>
    %cst_19 = arith.constant dense<0.000000e+00> : vector<4x16xf32>
    %44 = tpu.matmul %43, %31, %cst_19 {dimension_numbers = #tpu.dot_dimension_numbers<[1], [0], [0], [1], [0, 0, 1, 1], [], []>} : vector<4x8xf32>, vector<8x16xf32>, vector<4x16xf32> -> vector<4x16xf32>
    %cst_20 = arith.constant dense<0.000000e+00> : vector<4x32xf32>
    %45 = tpu.matmul %44, %28, %cst_20 {dimension_numbers = #tpu.dot_dimension_numbers<[1], [0], [0], [1], [0, 0, 1, 1], [], []>} : vector<4x16xf32>, vector<16x32xf32>, vector<4x32xf32> -> vector<4x32xf32>
    %46 = vector.extract_strided_slice %45 {offsets = [0, 0], sizes = [4, 16], strides = [1, 1]} : vector<4x32xf32> to vector<4x16xf32>
    %47 = vector.extract_strided_slice %45 {offsets = [0, 16], sizes = [4, 16], strides = [1, 1]} : vector<4x32xf32> to vector<4x16xf32>
    %cst_21 = arith.constant dense<0.000000e+00> : vector<8x4xf32>
    %48 = tpu.matmul %32, %46, %cst_21 {dimension_numbers = #tpu.dot_dimension_numbers<[1], [1], [0], [0], [0, 0, 1, 0], [], []>} : vector<8x16xf32>, vector<4x16xf32>, vector<8x4xf32> -> vector<8x4xf32>
    %cst_22 = arith.constant dense<0xFF800000> : vector<8xf32>
    %49 = vector.multi_reduction <maximumf>, %48, %cst_22 [1] : vector<8x4xf32> to vector<8xf32>
    %50 = vector.shape_cast %49 : vector<8xf32> to vector<8x1xf32>
    %51 = vector.broadcast %50 : vector<8x1xf32> to vector<8x4xf32>
    %52 = arith.subf %48, %51 : vector<8x4xf32>
    %53 = math.exp %52 : vector<8x4xf32>
    %cst_23 = arith.constant dense<0.000000e+00> : vector<8xf32>
    %54 = vector.multi_reduction <add>, %53, %cst_23 [1] : vector<8x4xf32> to vector<8xf32>
    %55 = vector.shape_cast %54 : vector<8xf32> to vector<8x1xf32>
    %56 = tpu.reciprocal %55 {approx = true} : vector<8x1xf32> -> vector<8x1xf32>
    %57 = vector.broadcast %56 : vector<8x1xf32> to vector<8x4xf32>
    %58 = arith.mulf %53, %57 : vector<8x4xf32>
    %cst_24 = arith.constant dense<0.000000e+00> : vector<8x16xf32>
    %59 = tpu.matmul %58, %47, %cst_24 {dimension_numbers = #tpu.dot_dimension_numbers<[1], [0], [0], [1], [0, 0, 1, 1], [], []>} : vector<8x4xf32>, vector<4x16xf32>, vector<8x16xf32> -> vector<8x16xf32>
    %c0_25 = arith.constant 0 : index
    %c0_26 = arith.constant 0 : index
    %c0_27 = arith.constant 0 : index
    %60 = vector.load %arg8[%c0_25, %c0_26, %c0_27] : memref<2x4x32xf32, #tpu.memory_space<vmem>>, vector<1x4x32xf32>
    %61 = vector.shape_cast %60 : vector<1x4x32xf32> to vector<4x32xf32>
    %62 = vector.shape_cast %45 : vector<4x32xf32> to vector<1x4x32xf32>
    tpu.vector_store %arg8[%c0_25, %c0_26, %c0_27], %62 {strides = array<i32>} : memref<2x4x32xf32, #tpu.memory_space<vmem>>, vector<1x4x32xf32>,
    %63 = vector.extract_strided_slice %26 {offsets = [8, 0], sizes = [8, 48], strides = [1, 1]} : vector<16x48xf32> to vector<8x48xf32>
    %64 = vector.extract_strided_slice %63 {offsets = [0, 0], sizes = [8, 16], strides = [1, 1]} : vector<8x48xf32> to vector<8x16xf32>
    %65 = vector.extract_strided_slice %63 {offsets = [0, 16], sizes = [8, 16], strides = [1, 1]} : vector<8x48xf32> to vector<8x16xf32>
    %66 = vector.extract_strided_slice %63 {offsets = [0, 32], sizes = [8, 16], strides = [1, 1]} : vector<8x48xf32> to vector<8x16xf32>
    %cst_28 = arith.constant dense<0.000000e+00> : vector<4x8xf32>
    %67 = tpu.matmul %27, %64, %cst_28 {dimension_numbers = #tpu.dot_dimension_numbers<[1], [1], [0], [0], [0, 0, 1, 0], [], []>} : vector<4x16xf32>, vector<8x16xf32>, vector<4x8xf32> -> vector<4x8xf32>
    %cst_29 = arith.constant dense<0xFF800000> : vector<4xf32>
    %68 = vector.multi_reduction <maximumf>, %67, %cst_29 [1] : vector<4x8xf32> to vector<4xf32>
    %69 = vector.shape_cast %68 : vector<4xf32> to vector<4x1xf32>
    %70 = vector.broadcast %69 : vector<4x1xf32> to vector<4x8xf32>
    %71 = arith.subf %67, %70 : vector<4x8xf32>
    %72 = math.exp %71 : vector<4x8xf32>
    %cst_30 = arith.constant dense<0.000000e+00> : vector<4xf32>
    %73 = vector.multi_reduction <add>, %72, %cst_30 [1] : vector<4x8xf32> to vector<4xf32>
    %74 = vector.shape_cast %73 : vector<4xf32> to vector<4x1xf32>
    %75 = tpu.reciprocal %74 {approx = true} : vector<4x1xf32> -> vector<4x1xf32>
    %76 = vector.broadcast %75 : vector<4x1xf32> to vector<4x8xf32>
    %77 = arith.mulf %72, %76 : vector<4x8xf32>
    %cst_31 = arith.constant dense<0.000000e+00> : vector<4x16xf32>
    %78 = tpu.matmul %77, %65, %cst_31 {dimension_numbers = #tpu.dot_dimension_numbers<[1], [0], [0], [1], [0, 0, 1, 1], [], []>} : vector<4x8xf32>, vector<8x16xf32>, vector<4x16xf32> -> vector<4x16xf32>
    %cst_32 = arith.constant dense<0.000000e+00> : vector<4x32xf32>
    %79 = tpu.matmul %78, %28, %cst_32 {dimension_numbers = #tpu.dot_dimension_numbers<[1], [0], [0], [1], [0, 0, 1, 1], [], []>} : vector<4x16xf32>, vector<16x32xf32>, vector<4x32xf32> -> vector<4x32xf32>
    %80 = vector.extract_strided_slice %79 {offsets = [0, 0], sizes = [4, 16], strides = [1, 1]} : vector<4x32xf32> to vector<4x16xf32>
    %81 = vector.extract_strided_slice %79 {offsets = [0, 16], sizes = [4, 16], strides = [1, 1]} : vector<4x32xf32> to vector<4x16xf32>
    %cst_33 = arith.constant dense<0.000000e+00> : vector<8x4xf32>
    %82 = tpu.matmul %66, %80, %cst_33 {dimension_numbers = #tpu.dot_dimension_numbers<[1], [1], [0], [0], [0, 0, 1, 0], [], []>} : vector<8x16xf32>, vector<4x16xf32>, vector<8x4xf32> -> vector<8x4xf32>
    %cst_34 = arith.constant dense<0xFF800000> : vector<8xf32>
    %83 = vector.multi_reduction <maximumf>, %82, %cst_34 [1] : vector<8x4xf32> to vector<8xf32>
    %84 = vector.shape_cast %83 : vector<8xf32> to vector<8x1xf32>
    %85 = vector.broadcast %84 : vector<8x1xf32> to vector<8x4xf32>
    %86 = arith.subf %82, %85 : vector<8x4xf32>
    %87 = math.exp %86 : vector<8x4xf32>
    %cst_35 = arith.constant dense<0.000000e+00> : vector<8xf32>
    %88 = vector.multi_reduction <add>, %87, %cst_35 [1] : vector<8x4xf32> to vector<8xf32>
    %89 = vector.shape_cast %88 : vector<8xf32> to vector<8x1xf32>
    %90 = tpu.reciprocal %89 {approx = true} : vector<8x1xf32> -> vector<8x1xf32>
    %91 = vector.broadcast %90 : vector<8x1xf32> to vector<8x4xf32>
    %92 = arith.mulf %87, %91 : vector<8x4xf32>
    %cst_36 = arith.constant dense<0.000000e+00> : vector<8x16xf32>
    %93 = tpu.matmul %92, %81, %cst_36 {dimension_numbers = #tpu.dot_dimension_numbers<[1], [0], [0], [1], [0, 0, 1, 1], [], []>} : vector<8x4xf32>, vector<4x16xf32>, vector<8x16xf32> -> vector<8x16xf32>
    %c1 = arith.constant 1 : index
    %c0_37 = arith.constant 0 : index
    %c0_38 = arith.constant 0 : index
    %94 = vector.load %arg8[%c1, %c0_37, %c0_38] : memref<2x4x32xf32, #tpu.memory_space<vmem>>, vector<1x4x32xf32>
    %95 = vector.shape_cast %94 : vector<1x4x32xf32> to vector<4x32xf32>
    %96 = vector.shape_cast %79 : vector<4x32xf32> to vector<1x4x32xf32>
    tpu.vector_store %arg8[%c1, %c0_37, %c0_38], %96 {strides = array<i32>} : memref<2x4x32xf32, #tpu.memory_space<vmem>>, vector<1x4x32xf32>,
    %97 = tpu.concatenate %59, %93 in 0 : vector<8x16xf32>, vector<8x16xf32> -> vector<16x16xf32>
    %c0_39 = arith.constant 0 : index
    %c0_40 = arith.constant 0 : index
    %98 = vector.load %arg6[%c0_39, %c0_40] : memref<16x32xf32, #tpu.memory_space<vmem>>, vector<16x32xf32>
    %cst_41 = arith.constant dense<0.000000e+00> : vector<16x32xf32>
    %99 = tpu.matmul %97, %98, %cst_41 {dimension_numbers = #tpu.dot_dimension_numbers<[1], [0], [0], [1], [0, 0, 1, 1], [], []>} : vector<16x16xf32>, vector<16x32xf32>, vector<16x32xf32> -> vector<16x32xf32>
    %100 = arith.addf %0, %99 : vector<16x32xf32>
    %c0_42 = arith.constant 0 : index
    %c0_43 = arith.constant 0 : index
    %101 = vector.load %arg7[%c0_42, %c0_43] : memref<16x32xf32, #tpu.memory_space<vmem>>, vector<16x32xf32>
    tpu.vector_store %arg7[%c0_42, %c0_43], %100 {strides = array<i32>} : memref<16x32xf32, #tpu.memory_space<vmem>>, vector<16x32xf32>,
    return
  }
}

</mosaic_0001>

<bundles_post_ra>
// kernel: neuronal_layer.1
= control target key start
LH: loop header
LB: loop body
LE: loop exit
PB: predicated region body
PF: predicated region fallthrough
CT: control target
= control target key end

     0   :  { %vm31_vm0 = vcmask 261120   ;;  %s1445_s0 = inlined_call_operand.vmem [shape: f32[16,32], index: 0, kind: input, shape index: {}]   ;;  %s1446_s1 = inlined_call_operand.vmem [shape: f32[1,32], index: 1, kind: input, shape index: {}]   ;;  %s1447_s2 = inlined_call_operand.vmem [shape: f32[1,32], index: 2, kind: input, shape index: {}]   ;;  %s1448_s3 = inlined_call_operand.vmem [shape: f32[32,48], index: 3, kind: input, shape index: {}]   ;;  %s1449_s4 = inlined_call_operand.vmem [shape: f32[4,16], index: 4, kind: input, shape index: {}]   ;;  %s1450_s5 = inlined_call_operand.vmem [shape: f32[16,32], index: 5, kind: input, shape index: {}]   ;;  %s1451_s6 = inlined_call_operand.vmem [shape: f32[16,32], index: 6, kind: input, shape index: {}]   ;;  %s1452_s7 = inlined_call_operand.hbm [shape: f32[16,32], index: 7, kind: output, shape index: {0}]   ;;  %s1453_s8 = inlined_call_operand.vmem [shape: f32[2,4,32], index: 8, kind: output, shape index: {1}]  }
   0x1   :  { %v1311_v0 = vld [vmem:[%s1445_s0] sm:$0xff]  ;;  %v1316_v1 = vld [vmem:[%s1445_s0 + $0x8] sm:$0xff] }
   0x2   :  { %14 = vsyncpa [#allocation3], 0  ;;  %v32_v2 = vsel %vm31_vm0, %v1311_v0, 0.0  ;;  %v35_v3 = vsel %vm31_vm0, %v1316_v1, 0.0  ;;  %v80_v14 = vld [vmem:[%s1448_s3 + $0x18] sm:$0xff]  ;;  %v79_v15 = vld [vmem:[%s1448_s3 + $0x10] sm:$0xff] }
   0x3   :  { %33 = vadd.xlane.f32.xlu0 %v32_v2  ;;  %1135 = vmatprep.subr.mxu0 %v80_v14  ;;  %v78_v16 = vld [vmem:[%s1448_s3 + $0x8] sm:$0xff]  ;;  %v77_v17 = vld [vmem:[%s1448_s3] sm:$0xff]  ;;  %v1256_v34 = vmov 0.0   ;;  %vm1257_vm1 = vmmov 0   ;;  %vm165_vm2 = vcmask 130048   ;;  %vm242_vm3 = vcmask 60416  }
   0x4   :  { %1136 = vmatpush3.msra.mxu0 %v80_v14  ;;  %v1080_v25 = vld [vmem:[%s1446_s1] ss:$0 sm:$0xff]  ;;  %1146 = vmatprep.subr.mxu1 %v1256_v34  ;;  %s1258_s3 = smov 112   ;;  %v164_v47 = vld [vmem:[%s1450_s5 + $0x8] sm:$0xff]  ;;  %vm257_vm4 = vcmask 64512   ;;  %vm571_vm5 = vcmask 257024  }
   0x5   :  { %1137 = vmatprep.subr.mxu0 %v79_v15  ;;  %v1081_v27 = vld [vmem:[%s1447_s2] ss:$0 sm:$0xff]  ;;  %1148 = vmatprep.mubr.msk.f32.mxu1 %vm1257_vm1, %v1256_v34  ;;  %vm481_vm6 = vcmask 31744   ;;  %vm498_vm7 = vcmask 1043456   ;;  %s1260_s30 = smov [#allocation2]  }
   0x6   :  { %1138 = vmatpush3.msra.mxu0 %v79_v15  ;;  %v162_v37 = vld [vmem:[%s1449_s4] sm:$0xf]  ;;  %s1259_s4 = smov 96  }
   0x7   :  { %36 = vadd.xlane.f32.xlu0 %v35_v3  ;;  %1139 = vmatprep.subr.mxu0 %v78_v16  ;;  %v163_v51 = vld [vmem:[%s1450_s5] sm:$0xff] }
   0x8   :  { %1140 = vmatpush3.msra.mxu0 %v78_v16 }
   0x9   :  { %1141 = vmatprep.subr.mxu0 %v77_v17 }
   0xa   :  { %1142 = vmatpush3.msra.mxu0 %v77_v17 }
   0xb   :  { %1156 = vmatprep.subr.mxu0 %v1256_v34 }
  0x8c   :  { %v34_v4 = vpop.xlane.xlu0 %33 }
  0x8d   :  { %v39_v5 = vmul.f32 0.03125, %v34_v4 }
  0x8f   :  { %v41_v6 = vsub.f32 %v1311_v0, %v39_v5 }
  0x90   :  { %v37_v7 = vpop.xlane.xlu0 %36 }
  0x91   :  { %v40_v8 = vmul.f32 0.03125, %v37_v7  ;;  %v43_v9 = vmul.f32 %v41_v6, %v41_v6 }
  0x93   :  { %v42_v10 = vsub.f32 %v1316_v1, %v40_v8  ;;  %v45_v11 = vsel %vm31_vm0, %v43_v9, 0.0 }
  0x94   :  { %46 = vadd.xlane.f32.xlu1 %v45_v11 }
  0x95   :  { %v44_v12 = vmul.f32 %v42_v10, %v42_v10 }
  0x97   :  { %v48_v13 = vsel %vm31_vm0, %v44_v12, 0.0 }
  0x98   :  { %49 = vadd.xlane.f32.xlu1 %v48_v13 }
 0x11d   :  { %v47_v18 = vpop.xlane.xlu1 %46 }
 0x11e   :  { %v51_v19 = vmul.f32 0.03125, %v47_v18 }
 0x120   :  { %v53_v20 = vadd.f32 1e-12, %v51_v19 }
 0x121   :  { %v50_v21 = vpop.xlane.xlu1 %49 }
 0x122   :  { %1214 = vrsqrt.f32 %v53_v20  ;;  %v52_v22 = vmul.f32 0.03125, %v50_v21 }
 0x124   :  { %v54_v23 = vadd.f32 1e-12, %v52_v22 }
 0x126   :  { %1216 = vrsqrt.f32 %v54_v23 }
 0x12f   :  { %v1215_v24 = vpop.eup %1214 }
 0x130   :  { %v57_v26 = vmul.f32 %v1215_v24, %v41_v6 }
 0x132   :  { %v66_v28 = vmul.f32 %v1080_v25, %v57_v26 }
 0x133   :  { %v1217_v29 = vpop.eup %1216 }
 0x134   :  { %v58_v30 = vmul.f32 %v1217_v29, %v42_v10  ;;  %v75_v31 = vadd.f32 %v1081_v27, %v66_v28 }
 0x136   :  { %v67_v32 = vmul.f32 %v1080_v25, %v58_v30  ;;  %1143 = vmatprep.mubr.msk.f32.mxu0 %vm31_vm0, %v75_v31 }
 0x138   :  { %v76_v33 = vadd.f32 %v1081_v27, %v67_v32 }
 0x13a   :  { %1144 = vmatmul.mubr.msk.f32.vlgmr.msra.gmra.mxu0 %vm31_vm0, %v76_v33 }
 0x13b   :  { %1160 = vmatprep.mubr.msk.f32.mxu0 %vm1257_vm1, %v1256_v34  ;;  %1157 = vmatpush3.msra.mxu0 %v164_v47 }
 0x13c   :  { %1158 = vmatprep.subr.mxu0 %v1256_v34 }
 0x13d   :  { %1159 = vmatpush3.msra.mxu0 %v163_v51 }
 0x13e   :  { %1168 = vmatprep.subr.mxu0 %v1256_v34 }
 0x1fa   :  { %v1352_v35 = vpop.f32.mrf.mxu0 }
 0x1fc   :  { %v153_v36 = vpop.f32.mrf.mxu0 }
 0x1fd   :  { %1147 = vmatpush3.xpose.msk.msra.mxu1 %vm165_vm2, %v153_v36 }
 0x1fe   :  { %1151 = vmatprep.subr.mxu1 %v1256_v34 }
 0x200   :  { %1149 = vmatmul.mubr.msk.f32.vlgmr.msra.gmra.mxu1 %vm165_vm2, %v162_v37 }
 0x201   :  { %1153 = vmatprep.mubr.msk.f32.mxu1 %vm1257_vm1, %v1256_v34 }
 0x2c0   :  { %v238_v38 = vpop.f32.mrf.mxu1 }
 0x2c1   :  { %v243_v39 = vsel %vm242_vm3, %v238_v38, -inf }
 0x2c2   :  { %244 = vmax.xlane.f32.xlu0 %v243_v39  ;;  %v1150_v40 = vpop.f32.mrf.mxu1 }
 0x2d8   :  { %254 = vrot.lane.b32.xlu0 %v153_v36, %s1258_s3 }
 0x34b   :  { %v245_v41 = vpop.xlane.xlu0 %244 }
 0x34c   :  { %v246_v42 = vsub.f32 %v238_v38, %v245_v41 }
 0x34e   :  { %v247_v43 = vmul.f32 1.442695, %v246_v42 }
 0x34f   :  { %v255_v44 = vpop.permute.xlu0 %254 }
 0x350   :  { %1218 = vpow2.f32 %v247_v43  ;;  %1152 = vmatpush3.msra.mxu1 %v255_v44 }
 0x351   :  { %1163 = vmatprep.subr.mxu1 %v1256_v34 }
 0x35d   :  { %v1219_v45 = vpop.eup %1218 }
 0x35e   :  { %v249_v46 = vsel %vm242_vm3, %v1219_v45, 0.0 }
 0x35f   :  { %250 = vadd.xlane.f32.xlu1 %v249_v46 }
 0x370   :  { %404 = vrot.lane.b32.xlu1 %v153_v36, %s1259_s4 }
 0x3e8   :  { %v251_v48 = vpop.xlane.xlu1 %250 }
 0x3e9   :  { %1220 = vrcp.f32 %v251_v48 }
 0x3ec   :  { %v405_v56 = vpop.permute.xlu1 %404 }
 0x3f6   :  { %v1221_v49 = vpop.eup %1220 }
 0x3f7   :  { %v253_v50 = vmul.f32 %v1221_v49, %v1219_v45 }
 0x3f9   :  { %1154 = vmatmul.mubr.msk.f32.vlgmr.msra.gmra.mxu1 %vm257_vm4, %v253_v50 }
 0x3fa   :  { %1165 = vmatprep.mubr.msk.f32.mxu1 %vm1257_vm1, %v1256_v34 }
 0x4b9   :  { %v327_v52 = vpop.f32.mrf.mxu1 }
 0x4ba   :  { %1161 = vmatmul.mubr.msk.f32.vlgmr.msra.gmra.mxu0 %vm165_vm2, %v327_v52 }
 0x4bb   :  { %v1155_v53 = vpop.f32.mrf.mxu1  ;;  %1170 = vmatprep.mubr.msk.f32.mxu0 %vm1257_vm1, %v1256_v34 }
 0x57a   :  { %v400_v54 = vpop.f32.mrf.mxu0 }
 0x57b   :  { %572 = vst.msk [vmem:[%s1453_s8] sm:$0xf] %vm571_vm5, %v400_v54  ;;  %1164 = vmatpush3.xpose.msk.msra.mxu1 %vm165_vm2, %v400_v54 }
 0x57c   :  { %v1162_v55 = vpop.f32.mrf.mxu0  ;;  %1173 = vmatprep.subr.mxu1 %v1256_v34 }
 0x57e   :  { %1166 = vmatmul.mubr.msk.f32.vlgmr.msra.gmra.mxu1 %vm165_vm2, %v405_v56 }
 0x57f   :  { %1174 = vmatpush3.xpose.msk.msra.mxu1 %vm165_vm2, %v1352_v35  ;;  %1175 = vmatprep.mubr.msk.f32.mxu1 %vm1257_vm1, %v1256_v34 }
 0x580   :  { %1183 = vmatprep.subr.mxu1 %v1256_v34 }
 0x582   :  { %1176 = vmatmul.mubr.msk.f32.vlgmr.msra.gmra.mxu1 %vm165_vm2, %v162_v37 }
 0x583   :  { %1184 = vmatpush3.msra.mxu1 %v164_v47  ;;  %1187 = vmatprep.mubr.msk.f32.mxu1 %vm1257_vm1, %v1256_v34 }
 0x584   :  { %1185 = vmatprep.subr.mxu1 %v1256_v34 }
 0x585   :  { %1186 = vmatpush3.msra.mxu1 %v163_v51 }
 0x586   :  { %1195 = vmatprep.subr.mxu1 %v1256_v34 }
 0x63e   :  { %v477_v57 = vpop.f32.mrf.mxu1 }
 0x63f   :  { %v482_v58 = vsel %vm481_vm6, %v477_v57, -inf }
 0x640   :  { %483 = vmax.xlane.f32.xlu1 %v482_v58  ;;  %v1167_v59 = vpop.f32.mrf.mxu1 }
 0x642   :  { %v642_v60 = vpop.f32.mrf.mxu1 }
 0x643   :  { %v646_v61 = vsel %vm242_vm3, %v642_v60, -inf }
 0x644   :  { %647 = vmax.xlane.f32.xlu0 %v646_v61  ;;  %v1177_v62 = vpop.f32.mrf.mxu1 }
 0x6c9   :  { %v484_v63 = vpop.xlane.xlu1 %483 }
 0x6ca   :  { %v485_v2 = vsub.f32 %v477_v57, %v484_v63 }
 0x6cc   :  { %v486_v3 = vmul.f32 1.442695, %v485_v2 }
 0x6cd   :  { %v648_v4 = vpop.xlane.xlu0 %647 }
 0x6ce   :  { %1222 = vpow2.f32 %v486_v3  ;;  %v649_v5 = vsub.f32 %v642_v60, %v648_v4 }
 0x6d0   :  { %v650_v6 = vmul.f32 1.442695, %v649_v5 }
 0x6d2   :  { %1224 = vpow2.f32 %v650_v6 }
 0x6db   :  { %v1223_v7 = vpop.eup %1222 }
 0x6dc   :  { %v488_v8 = vsel %vm481_vm6, %v1223_v7, 0.0 }
 0x6dd   :  { %489 = vadd.xlane.f32.xlu0 %v488_v8 }
 0x6df   :  { %v1225_v9 = vpop.eup %1224 }
 0x6e0   :  { %v652_v10 = vsel %vm242_vm3, %v1225_v9, 0.0 }
 0x6e1   :  { %653 = vadd.xlane.f32.xlu1 %v652_v10 }
 0x6f2   :  { %657 = vrot.lane.b32.xlu1 %v1352_v35, %s1258_s3 }
 0x6f3   :  { %493 = vrot.lane.b32.xlu0 %v400_v54, %s1258_s3 }
 0x6f6   :  { %806 = vrot.lane.b32.xlu1 %v1352_v35, %s1259_s4  ;;  %v973_v35 = vld [vmem:[%s1451_s6] sm:$0xff] }
 0x766   :  { %v490_v11 = vpop.xlane.xlu0 %489 }
 0x767   :  { %1226 = vrcp.f32 %v490_v11 }
 0x76a   :  { %v654_v12 = vpop.xlane.xlu1 %653  ;;  %v494_v13 = vpop.permute.xlu0 %493 }
 0x76b   :  { %1228 = vrcp.f32 %v654_v12  ;;  %1169 = vmatpush3.msk.msra.mxu0 %vm498_vm7, %v494_v13 }
 0x76c   :  { %1178 = vmatprep.subr.mxu0 %v1256_v34 }
 0x76e   :  { %v658_v16 = vpop.permute.xlu1 %657 }
 0x772   :  { %v807_v25 = vpop.permute.xlu1 %806 }
 0x774   :  { %v1227_v14 = vpop.eup %1226 }
 0x775   :  { %v492_v15 = vmul.f32 %v1227_v14, %v1223_v7 }
 0x777   :  { %1171 = vmatmul.mubr.msk.f32.vlgmr.msra.gmra.mxu0 %vm481_vm6, %v492_v15 }
 0x778   :  { %v1229_v17 = vpop.eup %1228  ;;  %1179 = vmatpush3.msra.mxu0 %v658_v16  ;;  %1180 = vmatprep.mubr.msk.f32.mxu0 %vm1257_vm1, %v1256_v34 }
 0x779   :  { %v656_v18 = vmul.f32 %v1229_v17, %v1225_v9  ;;  %1190 = vmatprep.subr.mxu0 %v1256_v34 }
 0x77b   :  { %1181 = vmatmul.mubr.msk.f32.vlgmr.msra.gmra.mxu0 %vm257_vm4, %v656_v18 }
 0x77c   :  { %1192 = vmatprep.mubr.msk.f32.mxu0 %vm1257_vm1, %v1256_v34 }
 0x837   :  { %v567_v19 = vpop.f32.mrf.mxu0 }
 0x839   :  { %v1172_v20 = vpop.f32.mrf.mxu0 }
 0x83b   :  { %v729_v21 = vpop.f32.mrf.mxu0 }
 0x83c   :  { %1188 = vmatmul.mubr.msk.f32.vlgmr.msra.gmra.mxu1 %vm165_vm2, %v729_v21 }
 0x83d   :  { %v1182_v22 = vpop.f32.mrf.mxu0  ;;  %1197 = vmatprep.mubr.msk.f32.mxu1 %vm1257_vm1, %v1256_v34  ;;  %v974_v34 = vld [vmem:[%s1451_s6 + $0x8] sm:$0xff]  ;;  %s1065_s6 = sshll.u32 %s1260_s30, 4  ;;  %s1066_s6 = int_to_ptr.vmem [resolvable:$true] %s1065_s6 }
 0x83e   :  { %s1234_s0 = scalar_lea.vmem %s1066_s6, 256  ;;  %p1239_p1 = scmp.lt.s32.totalorder %s1066_s6, %s1066_s6 }
 0x83f   :  { %p1235_p0 = scmp.ne.s32.totalorder %s1066_s6, %s1234_s0  ;;  %p1240_p2 = scmp.lt.s32.totalorder %s1234_s0, %s1234_s0 }
 0x841   :  { %p1241_p3 = por %p1240_p2, %p1239_p1 }
 0x843   :  { %p1242_p4 = pnand %p1241_p3, %p1235_p0 }
 0x8fc   :  { %v802_v23 = vpop.f32.mrf.mxu1 }
 0x8fd   :  { %1100 = vst.msk [vmem:[%s1453_s8 + $0x4] sm:$0xf] %vm571_vm5, %v802_v23  ;;  %1191 = vmatpush3.xpose.msk.msra.mxu0 %vm165_vm2, %v802_v23 }
 0x8fe   :  { %v1189_v24 = vpop.f32.mrf.mxu1  ;;  %1200 = vmatprep.subr.mxu0 %v974_v34 }
 0x900   :  { %1193 = vmatmul.mubr.msk.f32.vlgmr.msra.gmra.mxu0 %vm165_vm2, %v807_v25 }
 0x901   :  { %1204 = vmatprep.mubr.msk.f32.mxu0 %vm165_vm2, %v567_v19  ;;  %1201 = vmatpush3.msra.mxu0 %v974_v34 }
 0x902   :  { %1202 = vmatprep.subr.mxu0 %v973_v35 }
 0x903   :  { %1203 = vmatpush3.msra.mxu0 %v973_v35 }
 0x9c0   :  { %v879_v26 = vpop.f32.mrf.mxu0 }
 0x9c1   :  { %v883_v27 = vsel %vm481_vm6, %v879_v26, -inf }
 0x9c2   :  { %884 = vmax.xlane.f32.xlu1 %v883_v27  ;;  %v1194_v28 = vpop.f32.mrf.mxu0 }
 0xa4b   :  { %v885_v29 = vpop.xlane.xlu1 %884 }
 0xa4c   :  { %v886_v30 = vsub.f32 %v879_v26, %v885_v29 }
 0xa4e   :  { %v887_v31 = vmul.f32 1.442695, %v886_v30 }
 0xa50   :  { %1230 = vpow2.f32 %v887_v31 }
 0xa5d   :  { %v1231_v32 = vpop.eup %1230 }
 0xa5e   :  { %v889_v33 = vsel %vm481_vm6, %v1231_v32, 0.0 }
 0xa5f   :  { %890 = vadd.xlane.f32.xlu0 %v889_v33 }
 0xa75   :  { %894 = vrot.lane.b32.xlu0 %v802_v23, %s1258_s3 }
 0xae8   :  { %v891_v36 = vpop.xlane.xlu0 %890 }
 0xae9   :  { %1232 = vrcp.f32 %v891_v36 }
 0xaec   :  { %v895_v37 = vpop.permute.xlu0 %894 }
 0xaed   :  { %1196 = vmatpush3.msk.msra.mxu1 %vm498_vm7, %v895_v37 }
 0xaf6   :  { %v1233_v38 = vpop.eup %1232 }
 0xaf7   :  { %v893_v39 = vmul.f32 %v1233_v38, %v1231_v32 }
 0xaf9   :  { %1198 = vmatmul.mubr.msk.f32.vlgmr.msra.gmra.mxu1 %vm481_vm6, %v893_v39 }
 0xbb9   :  { %v967_v40 = vpop.f32.mrf.mxu1 }
 0xbba   :  { %1205 = vmatmul.mubr.msk.f32.vlgmr.msra.gmra.mxu0 %vm165_vm2, %v967_v40 }
 0xbbb   :  { %v1199_v41 = vpop.f32.mrf.mxu1 }
 0xc7a   :  { %v1206_v42 = vpop.f32.mrf.mxu0 }
 0xc7b   :  { %v1057_v43 = vadd.f32 %v1206_v42, %v1316_v1 }
 0xc7c   :  { %v1047_v44 = vpop.f32.mrf.mxu0 }
 0xc7d   :  { %1059 = vst.msk [vmem:[#allocation2 + $0x8] sm:$0xff] %vm31_vm0, %v1057_v43  ;;  %v1056_v45 = vadd.f32 %v1047_v44, %v1311_v0 }
 0xc7f   :  { %1058 = vst.msk [vmem:[#allocation2] sm:$0xff] %vm31_vm0, %v1056_v45 }
 0xc80   :  { %1245 = shalt.err (!%p1242_p4)
}
 0xc81   :  { %s1261_s9 = smov 128   ;;  %s1262_s10 = smov 8  }
 0xc82   :  { %1071 = dma.vmem_to_hbm [thread:$0]  %s1066_s6, 256, %s1452_s7, [#allocation3], %s1261_s9, %s1261_s9, %s1262_s10  }
 0xc83   :  { %1254 = dma.done.wait [#allocation3], 256  }
 0xc84   :  { %1255 = vsyncadd [#allocation3], 4294967040 }
 0xc85   :  { %1079 = vsyncpa [#allocation3], 1 }

</bundles_post_ra>
